<compile_context>
chip_gen: v6e
topology: v6e:2x2x1
jax: 0.10.0
libtpu: 0.0.40
codegen_flags: <defaults>
</compile_context>

<pallas_src>
import functools

import jax
import jax.numpy as jnp
from jax.experimental import pallas as pl
from jax.experimental.pallas import tpu as pltpu


def _round_up(x, m):
    return ((x + m - 1) // m) * m


def _cdiv(a, b):
    return -(-a // b)


def mlp_kernel(x_ref, w1_ref, b1_ref, w2_ref, b2_ref, w3_ref, b3_ref, o_ref):
    # Feature-major: x is (20, TB); all activations are (features, batch) and
    # lane-dense, so every layer is a plain MXU matmul.
    x = x_ref[...]                                                      # (20, TB)
    h1 = jnp.dot(w1_ref[...], x, preferred_element_type=jnp.float32)   # (64, TB) MXU
    h1 = jnp.maximum(h1 + b1_ref[...], 0.0)                            # VPU relu
    h2 = jnp.dot(w2_ref[...], h1, preferred_element_type=jnp.float32)  # (64, TB) MXU
    h2 = jnp.maximum(h2 + b2_ref[...], 0.0)                            # VPU relu
    z = jnp.dot(w3_ref[...], h2, preferred_element_type=jnp.float32)   # (1, TB)  MXU
    o_ref[...] = jax.nn.sigmoid(z + b3_ref[...]).astype(o_ref.dtype)   # EUP sigmoid


def _choose_tile(batch, block_b):
    """Batch tile: multiple of 128, capped by block_b, >=2 grid steps whenever the
    128-padded batch can be split (v7x megacore), rows spread evenly over steps
    to bound padding waste."""
    bp128 = _round_up(batch, 128)
    cap = max(128, _round_up(block_b, 128))
    if bp128 <= 128:
        return 128
    n_steps = max(2, _cdiv(bp128, cap))
    return min(cap, _round_up(_cdiv(bp128, n_steps), 128))


@functools.partial(jax.jit, static_argnames=("block_b",))
def mymodel_forward(x, params, *, block_b=2048):
    """x: (B, 20) float32; params stored PyTorch-style (W: (out,in), b: (out,)).
    Returns (B, 1) sigmoid probabilities."""
    B, K = x.shape
    w1, b1, w2, b2, w3, b3 = (params[k] for k in ("w1", "b1", "w2", "b2", "w3", "b3"))
    H1, H2 = w1.shape[0], w2.shape[0]

    TB = _choose_tile(B, block_b)
    Bp = _round_up(B, TB)

    # Feature-major (features x batch) layout; pad batch (lanes) to the tile.
    xt = x.T
    if Bp != B:
        xt = jnp.pad(xt, ((0, 0), (0, Bp - B)))

    # Biases as (out, 1) columns broadcasting along the lane (batch) axis.
    b1c = b1.reshape(H1, 1)
    b2c = b2.reshape(H2, 1)
    b3c = b3.reshape(1, 1)

    # Constant index_map => same block every step => weights resident in VMEM.
    full = lambda a: pl.BlockSpec(a.shape, lambda i, _n=a.ndim: (0,) * _n)

    flops = 2 * Bp * (K * H1 + H1 * H2 + H2 * 1)
    bytes_accessed = 4 * (Bp * K + Bp + K * H1 + H1 + H1 * H2 + H2 + H2 + 1)

    out_row = pl.pallas_call(
        mlp_kernel,
        out_shape=jax.ShapeDtypeStruct((1, Bp), jnp.float32),
        grid_spec=pl.GridSpec(
            grid=(Bp // TB,),
            in_specs=[
                pl.BlockSpec((K, TB), lambda i: (0, i)),        # x: tiled over batch lanes
                full(w1), full(b1c), full(w2), full(b2c), full(w3), full(b3c),
            ],
            out_specs=pl.BlockSpec((1, TB), lambda i: (0, i)),  # lane-dense output row
        ),
        compiler_params=pltpu.CompilerParams(
            dimension_semantics=("parallel",),                  # megacore split on v7x
        ),
        cost_estimate=pl.CostEstimate(
            flops=flops, transcendentals=Bp, bytes_accessed=bytes_accessed),
    )(xt, w1, b1c, w2, b2c, w3, b3c)

    return out_row[0, :B].reshape(B, 1)


def init_params(key):
    """Deterministic init mimicking PyTorch nn.Linear default U[-1/sqrt(fan_in), ...],
    stored PyTorch-style: W (out, in), b (out,)."""
    def linear(key, fan_in, fan_out):
        kw, kb = jax.random.split(key)
        bound = 1.0 / jnp.sqrt(jnp.float32(fan_in))
        w = jax.random.uniform(kw, (fan_out, fan_in), jnp.float32, -bound, bound)
        b = jax.random.uniform(kb, (fan_out,), jnp.float32, -bound, bound)
        return w, b

    k1, k2, k3 = jax.random.split(key, 3)
    w1, b1 = linear(k1, 20, 64)
    w2, b2 = linear(k2, 64, 64)
    w3, b3 = linear(k3, 64, 1)
    return {"w1": w1, "b1": b1, "w2": w2, "b2": b2, "w3": w3, "b3": b3}


def mymodel_forward_ref(x, params):
    """Pure-JAX reference (PyTorch semantics: y = x @ W.T + b)."""
    h = jnp.maximum(x @ params["w1"].T + params["b1"], 0.0)
    h = jnp.maximum(h @ params["w2"].T + params["b2"], 0.0)
    return jax.nn.sigmoid(h @ params["w3"].T + params["b3"])


if __name__ == "__main__":
    key = jax.random.PRNGKey(0)
    kx, kp = jax.random.split(key)
    params = init_params(kp)

    # Small demo batch (20 input features as in the nn.Module).
    B = 8
    x = jax.random.normal(kx, (B, 20), jnp.float32)
    out = jax.block_until_ready(mymodel_forward(x, params))
    ref = mymodel_forward_ref(x, params)
    assert out.shape == (B, 1)
    assert jnp.allclose(out, ref, atol=1e-5, rtol=1e-5), "mismatch vs reference (B=8)"

    # Multi-step grid + batch-padding path (B not a multiple of 128): with the
    # default block_b the tile chooser yields TB=256, grid=(2,), Bp=512.
    B2 = 300
    x2 = jax.random.normal(jax.random.PRNGKey(1), (B2, 20), jnp.float32)
    out2 = jax.block_until_ready(mymodel_forward(x2, params))
    ref2 = mymodel_forward_ref(x2, params)
    assert out2.shape == (B2, 1)
    assert jnp.allclose(out2, ref2, atol=1e-5, rtol=1e-5), "mismatch vs reference (B=300)"

    print("KERNEL_OK")
</pallas_src>

<mosaic_0001>
module attributes {stable_mosaic.version = 11 : i64} {
  func.func @mlp_kernel(%arg0: i32, %arg1: memref<20x128xf32, #tpu.memory_space<vmem>>, %arg2: memref<64x20xf32, #tpu.memory_space<vmem>>, %arg3: memref<64x1xf32, #tpu.memory_space<vmem>>, %arg4: memref<64x64xf32, #tpu.memory_space<vmem>>, %arg5: memref<64x1xf32, #tpu.memory_space<vmem>>, %arg6: memref<1x64xf32, #tpu.memory_space<vmem>>, %arg7: memref<1x1xf32, #tpu.memory_space<vmem>>, %arg8: memref<1x128xf32, #tpu.memory_space<vmem>>) attributes {dimension_semantics = [#tpu.dimension_semantics<parallel>], iteration_bounds = array<i64: 1>, scalar_prefetch = 0 : i64, scratch_operands = 0 : i64, tpu.core_type = #tpu.core_type<tc>, window_params = [{transform_indices = @transform_0, window_bounds = array<i64: 20, 128>}, {pipeline_mode = #tpu.pipeline_mode<synchronous>, transform_indices = @transform_1, window_bounds = array<i64: 64, 20>}, {pipeline_mode = #tpu.pipeline_mode<synchronous>, transform_indices = @transform_2, window_bounds = array<i64: 64, 1>}, {pipeline_mode = #tpu.pipeline_mode<synchronous>, transform_indices = @transform_3, window_bounds = array<i64: 64, 64>}, {pipeline_mode = #tpu.pipeline_mode<synchronous>, transform_indices = @transform_4, window_bounds = array<i64: 64, 1>}, {pipeline_mode = #tpu.pipeline_mode<synchronous>, transform_indices = @transform_5, window_bounds = array<i64: 1, 64>}, {pipeline_mode = #tpu.pipeline_mode<synchronous>, transform_indices = @transform_6, window_bounds = array<i64: 1, 1>}, {transform_indices = @transform_7, window_bounds = array<i64: 1, 128>}]} {
    %c0 = arith.constant 0 : index
    %c0_0 = arith.constant 0 : index
    %0 = vector.load %arg1[%c0, %c0_0] : memref<20x128xf32, #tpu.memory_space<vmem>>, vector<20x128xf32>
    %c0_1 = arith.constant 0 : index
    %c0_2 = arith.constant 0 : index
    %1 = vector.load %arg2[%c0_1, %c0_2] : memref<64x20xf32, #tpu.memory_space<vmem>>, vector<64x20xf32>
    %cst = arith.constant dense<0.000000e+00> : vector<64x128xf32>
    %2 = tpu.matmul %1, %0, %cst {dimension_numbers = #tpu.dot_dimension_numbers<[1], [0], [0], [1], [0, 0, 1, 1], [], []>} : vector<64x20xf32>, vector<20x128xf32>, vector<64x128xf32> -> vector<64x128xf32>
    %c0_3 = arith.constant 0 : index
    %c0_4 = arith.constant 0 : index
    %3 = vector.load %arg3[%c0_3, %c0_4] : memref<64x1xf32, #tpu.memory_space<vmem>>, vector<64x1xf32>
    %4 = vector.broadcast %3 : vector<64x1xf32> to vector<64x128xf32>
    %5 = arith.addf %2, %4 : vector<64x128xf32>
    %cst_5 = arith.constant 0.000000e+00 : f32
    %6 = vector.broadcast %cst_5 : f32 to vector<64x128xf32>
    %7 = arith.maximumf %5, %6 : vector<64x128xf32>
    %c0_6 = arith.constant 0 : index
    %c0_7 = arith.constant 0 : index
    %8 = vector.load %arg4[%c0_6, %c0_7] : memref<64x64xf32, #tpu.memory_space<vmem>>, vector<64x64xf32>
    %cst_8 = arith.constant dense<0.000000e+00> : vector<64x128xf32>
    %9 = tpu.matmul %8, %7, %cst_8 {dimension_numbers = #tpu.dot_dimension_numbers<[1], [0], [0], [1], [0, 0, 1, 1], [], []>} : vector<64x64xf32>, vector<64x128xf32>, vector<64x128xf32> -> vector<64x128xf32>
    %c0_9 = arith.constant 0 : index
    %c0_10 = arith.constant 0 : index
    %10 = vector.load %arg5[%c0_9, %c0_10] : memref<64x1xf32, #tpu.memory_space<vmem>>, vector<64x1xf32>
    %11 = vector.broadcast %10 : vector<64x1xf32> to vector<64x128xf32>
    %12 = arith.addf %9, %11 : vector<64x128xf32>
    %cst_11 = arith.constant 0.000000e+00 : f32
    %13 = vector.broadcast %cst_11 : f32 to vector<64x128xf32>
    %14 = arith.maximumf %12, %13 : vector<64x128xf32>
    %c0_12 = arith.constant 0 : index
    %c0_13 = arith.constant 0 : index
    %15 = vector.load %arg6[%c0_12, %c0_13] : memref<1x64xf32, #tpu.memory_space<vmem>>, vector<1x64xf32>
    %cst_14 = arith.constant dense<0.000000e+00> : vector<1x128xf32>
    %16 = tpu.matmul %15, %14, %cst_14 {dimension_numbers = #tpu.dot_dimension_numbers<[1], [0], [0], [1], [0, 0, 1, 1], [], []>} : vector<1x64xf32>, vector<64x128xf32>, vector<1x128xf32> -> vector<1x128xf32>
    %c0_15 = arith.constant 0 : index
    %c0_16 = arith.constant 0 : index
    %17 = vector.load %arg7[%c0_15, %c0_16] : memref<1x1xf32, #tpu.memory_space<vmem>>, vector<1x1xf32>
    %18 = vector.broadcast %17 : vector<1x1xf32> to vector<1x128xf32>
    %19 = arith.addf %16, %18 : vector<1x128xf32>
    %20 = arith.negf %19 : vector<1x128xf32>
    %21 = math.exp %20 : vector<1x128xf32>
    %cst_17 = arith.constant 1.000000e+00 : f32
    %22 = vector.broadcast %cst_17 : f32 to vector<1x128xf32>
    %23 = arith.addf %22, %21 : vector<1x128xf32>
    %24 = arith.divf %22, %23 : vector<1x128xf32>
    %c0_18 = arith.constant 0 : index
    %c0_19 = arith.constant 0 : index
    %25 = vector.load %arg8[%c0_18, %c0_19] : memref<1x128xf32, #tpu.memory_space<vmem>>, vector<1x128xf32>
    tpu.vector_store %arg8[%c0_18, %c0_19], %24 {strides = array<i32>} : memref<1x128xf32, #tpu.memory_space<vmem>>, vector<1x128xf32>,
    return
  }
  func.func @transform_0(%arg0: i32) -> (i32, i32) {
    %c0_i32 = arith.constant 0 : i32
    %c0_i32_0 = arith.constant 0 : i32
    return %c0_i32, %arg0 : i32, i32
  }
  func.func @transform_1(%arg0: i32) -> (i32, i32) {
    %c0_i32 = arith.constant 0 : i32
    %c0_i32_0 = arith.constant 0 : i32
    %c0_i32_1 = arith.constant 0 : i32
    return %c0_i32, %c0_i32_0 : i32, i32
  }
  func.func @transform_2(%arg0: i32) -> (i32, i32) {
    %c0_i32 = arith.constant 0 : i32
    %c0_i32_0 = arith.constant 0 : i32
    %c0_i32_1 = arith.constant 0 : i32
    return %c0_i32, %c0_i32_0 : i32, i32
  }
  func.func @transform_3(%arg0: i32) -> (i32, i32) {
    %c0_i32 = arith.constant 0 : i32
    %c0_i32_0 = arith.constant 0 : i32
    %c0_i32_1 = arith.constant 0 : i32
    return %c0_i32, %c0_i32_0 : i32, i32
  }
  func.func @transform_4(%arg0: i32) -> (i32, i32) {
    %c0_i32 = arith.constant 0 : i32
    %c0_i32_0 = arith.constant 0 : i32
    %c0_i32_1 = arith.constant 0 : i32
    return %c0_i32, %c0_i32_0 : i32, i32
  }
  func.func @transform_5(%arg0: i32) -> (i32, i32) {
    %c0_i32 = arith.constant 0 : i32
    %c0_i32_0 = arith.constant 0 : i32
    %c0_i32_1 = arith.constant 0 : i32
    return %c0_i32, %c0_i32_0 : i32, i32
  }
  func.func @transform_6(%arg0: i32) -> (i32, i32) {
    %c0_i32 = arith.constant 0 : i32
    %c0_i32_0 = arith.constant 0 : i32
    %c0_i32_1 = arith.constant 0 : i32
    return %c0_i32, %c0_i32_0 : i32, i32
  }
  func.func @transform_7(%arg0: i32) -> (i32, i32) {
    %c0_i32 = arith.constant 0 : i32
    %c0_i32_0 = arith.constant 0 : i32
    return %c0_i32, %arg0 : i32, i32
  }
}

</mosaic_0001>

<bundles_post_ra>
// kernel: mymodel_forward.1
= control target key start
LH: loop header
LB: loop body
LE: loop exit
PB: predicated region body
PF: predicated region fallthrough
CT: control target
= control target key end

     0   :  { %vm112_vm0 = vcmask 1043456   ;;  %vm87_vm1 = vcmask 162816   ;;  %v647_v2 = vmov 0   ;;  %vm285_vm2 = vcmask 523264   ;;  %s821_s0 = inlined_call_operand.vmem [shape: f32[20,128], index: 0, kind: input, shape index: {}]   ;;  %s822_s1 = inlined_call_operand.vmem [shape: f32[64,20], index: 1, kind: input, shape index: {}]   ;;  %s823_s6 = inlined_call_operand.<no memory space> [shape: f32[1,1], index: 6, kind: input, shape index: {}]   ;;  %s824_s2 = inlined_call_operand.vmem [shape: f32[64,1], index: 2, kind: input, shape index: {}]   ;;  %s825_s4 = inlined_call_operand.vmem [shape: f32[64,1], index: 4, kind: input, shape index: {}]   ;;  %s826_s3 = inlined_call_operand.vmem [shape: f32[64,64], index: 3, kind: input, shape index: {}]   ;;  %s827_s5 = inlined_call_operand.vmem [shape: f32[1,64], index: 5, kind: input, shape index: {}]   ;;  %s828_s7 = inlined_call_operand.vmem [shape: f32[1,128], index: 7, kind: output, shape index: {}]  }
   0x1   :  { %v30_v0 = vld [vmem:[%s821_s0 + $0x10] sm:$0xf]  ;;  %v29_v1 = vld [vmem:[%s821_s0 + $0x8] sm:$0xff]  ;;  %641 = vset.pattern.permute.xlu0 %v647_v2  ;;  %642 = vset.pattern.permute.xlu1 %v647_v2  ;;  %v12_v3 = vstv %s823_s6  ;;  %v31_v4 = vld [vmem:[%s822_s1] sm:$0xff]  ;;  %vm649_vm3 = vmmov 0  }
   0x2   :  { %573 = vmatprep.subr.msk.mxu0 %vm112_vm0, %v30_v0  ;;  %13 = vst [vmem:[#allocation2] sm:$0x1] %v12_v3  ;;  %v28_v5 = vld [vmem:[%s821_s0] sm:$0xff]  ;;  %579 = vmatprep.mubr.msk.f32.mxu0 %vm87_vm1, %v31_v4  ;;  %v46_v6 = vld [vmem:[%s824_s2 + $0x38] sm:$0xff]  ;;  %v32_v7 = vld [vmem:[%s822_s1 + $0x8] sm:$0xff] }
   0x3   :  { %574 = vmatpush3.msk.msra.mxu0 %vm112_vm0, %v30_v0  ;;  %84 = vperm.xlu0 %641, %v46_v6   ;;  %v44_v8 = vld [vmem:[%s824_s2 + $0x28] sm:$0xff]  ;;  %v33_v9 = vld [vmem:[%s822_s1 + $0x10] sm:$0xff]  ;;  %v43_v11 = vld [vmem:[%s824_s2 + $0x20] sm:$0xff]  ;;  %v648_v6 = vmov 0.0  }
   0x4   :  { %575 = vmatprep.subr.mxu0 %v29_v1  ;;  %v45_v10 = vld [vmem:[%s824_s2 + $0x30] sm:$0xff]  ;;  %74 = vperm.xlu1 %642, %v44_v8   ;;  %v34_v12 = vld [vmem:[%s822_s1 + $0x18] sm:$0xff]  ;;  %v35_v13 = vld [vmem:[%s822_s1 + $0x20] sm:$0xff] }
   0x5   :  { %576 = vmatpush3.msra.mxu0 %v29_v1  ;;  %v42_v14 = vld [vmem:[%s824_s2 + $0x18] sm:$0xff]  ;;  %v41_v15 = vld [vmem:[%s824_s2 + $0x10] sm:$0xff]  ;;  %v36_v16 = vld [vmem:[%s822_s1 + $0x28] sm:$0xff] }
   0x6   :  { %577 = vmatprep.subr.mxu0 %v28_v5  ;;  %v37_v17 = vld [vmem:[%s822_s1 + $0x30] sm:$0xff]  ;;  %v40_v18 = vld [vmem:[%s824_s2 + $0x8] sm:$0xff]  ;;  %v39_v19 = vld [vmem:[%s824_s2] sm:$0xff] }
   0x7   :  { %578 = vmatpush3.msra.mxu0 %v28_v5  ;;  %79 = vperm.xlu0 %641, %v45_v10   ;;  %v38_v20 = vld [vmem:[%s822_s1 + $0x38] sm:$0xff]  ;;  %v243_v22 = vld [vmem:[%s825_s4 + $0x30] sm:$0xff]  ;;  %v242_v23 = vld [vmem:[%s825_s4 + $0x28] sm:$0xff] }
   0x8   :  { %580 = vmatmul.mubr.msk.f32.vlgmr.msra.gmra.mxu0 %vm87_vm1, %v32_v7  ;;  %69 = vperm.xlu1 %642, %v43_v11   ;;  %v244_v21 = vld [vmem:[%s825_s4 + $0x38] sm:$0xff]  ;;  %v241_v24 = vld [vmem:[%s825_s4 + $0x20] sm:$0xff]  ;;  %v239_v26 = vld [vmem:[%s825_s4 + $0x10] sm:$0xff] }
   0x9   :  { %582 = vmatprep.mubr.msk.f32.mxu0 %vm87_vm1, %v33_v9  ;;  %v240_v25 = vld [vmem:[%s825_s4 + $0x18] sm:$0xff]  ;;  %v238_v27 = vld [vmem:[%s825_s4 + $0x8] sm:$0xff]  ;;  %v237_v28 = vld [vmem:[%s825_s4] sm:$0xff]  ;;  %619 = vmatprep.subr.mxu0 %v648_v6 }
   0xa   :  { %v424_v29 = vld [vmem:[#allocation2] sm:$0x1]  ;;  %v230_v63 = vld [vmem:[%s826_s3 + $0x8] sm:$0xff]  ;;  %v231_v0 = vld [vmem:[%s826_s3 + $0x10] sm:$0xff] }
   0xb   :  { %64 = vperm.xlu0 %641, %v42_v14   ;;  %v229_v30 = vld [vmem:[%s826_s3] sm:$0xff]  ;;  %v232_v1 = vld [vmem:[%s826_s3 + $0x18] sm:$0xff]  ;;  %v234_v3 = vld [vmem:[%s826_s3 + $0x28] sm:$0xff] }
   0xc   :  { %583 = vmatmul.mubr.msk.f32.gmra.mxu0 %vm87_vm1, %v34_v12  ;;  %59 = vperm.xlu1 %642, %v41_v15   ;;  %v233_v2 = vld [vmem:[%s826_s3 + $0x20] sm:$0xff]  ;;  %v235_v4 = vld [vmem:[%s826_s3 + $0x30] sm:$0xff]  ;;  %v236_v5 = vld [vmem:[%s826_s3 + $0x38] sm:$0xff] }
   0xd   :  { %585 = vmatprep.mubr.msk.f32.mxu0 %vm87_vm1, %v35_v13  ;;  %607 = vmatprep.mubr.msk.f32.mxu1 %vm285_vm2, %v229_v30 }
   0xf   :  { %54 = vperm.xlu0 %641, %v40_v18  }
  0x10   :  { %586 = vmatmul.mubr.msk.f32.gmra.mxu0 %vm87_vm1, %v36_v16  ;;  %49 = vperm.xlu1 %642, %v39_v19  }
  0x11   :  { %588 = vmatprep.mubr.msk.f32.mxu0 %vm87_vm1, %v37_v17 }
  0x13   :  { %282 = vperm.xlu0 %641, %v244_v21  }
  0x14   :  { %589 = vmatmul.mubr.msk.f32.gmra.mxu0 %vm87_vm1, %v38_v20  ;;  %277 = vperm.xlu1 %642, %v243_v22  }
  0x15   :  { %635 = vmatprep.mubr.msk.f32.mxu0 %vm649_vm3, %v648_v6 }
  0x17   :  { %272 = vperm.xlu0 %641, %v242_v23  }
  0x18   :  { %267 = vperm.xlu1 %642, %v241_v24  }
  0x1b   :  { %262 = vperm.xlu0 %641, %v240_v25  }
  0x1c   :  { %257 = vperm.xlu1 %642, %v239_v26  }
  0x1f   :  { %252 = vperm.xlu0 %641, %v238_v27  }
  0x20   :  { %247 = vperm.xlu1 %642, %v237_v28  }
  0x23   :  { %427 = vperm.xlu0 %641, %v424_v29  }
  0x7e   :  { %v85_v33 = vpop.permute.xlu0 %84 }
  0x7f   :  { %v75_v35 = vpop.permute.xlu1 %74 }
  0x82   :  { %v80_v38 = vpop.permute.xlu0 %79 }
  0x83   :  { %v70_v40 = vpop.permute.xlu1 %69 }
  0x86   :  { %v65_v47 = vpop.permute.xlu0 %64 }
  0x87   :  { %v60_v50 = vpop.permute.xlu1 %59 }
  0x8a   :  { %v55_v55 = vpop.permute.xlu0 %54 }
  0x8b   :  { %v50_v58 = vpop.permute.xlu1 %49 }
  0x8e   :  { %v283_v9 = vpop.permute.xlu0 %282 }
  0x8f   :  { %v278_v11 = vpop.permute.xlu1 %277 }
  0x92   :  { %v273_v14 = vpop.permute.xlu0 %272 }
  0x93   :  { %v268_v16 = vpop.permute.xlu1 %267 }
  0x96   :  { %v263_v23 = vpop.permute.xlu0 %262 }
  0x97   :  { %v258_v26 = vpop.permute.xlu1 %257 }
  0xc8   :  { %v581_v31 = vpop.f32.mrf.mxu0 }
  0xc9   :  { %v188_v56 = vadd.f32 %v581_v31, %v55_v55  ;;  %v253_v31 = vpop.permute.xlu0 %252 }
  0xca   :  { %v182_v32 = vpop.f32.mrf.mxu0 }
  0xcb   :  { %v183_v59 = vadd.f32 %v182_v32, %v50_v58  ;;  %v222_v61 = vmax.f32 %v188_v56, 0.0 }
  0xcc   :  { %v584_v34 = vpop.f32.mrf.mxu0 }
  0xcd   :  { %v198_v51 = vadd.f32 %v584_v34, %v65_v47  ;;  %v221_v62 = vmax.f32 %v183_v59, 0.0  ;;  %v248_v34 = vpop.permute.xlu1 %247 }
  0xce   :  { %v192_v36 = vpop.f32.mrf.mxu0 }
  0xcf   :  { %v193_v53 = vadd.f32 %v192_v36, %v60_v50  ;;  %v224_v57 = vmax.f32 %v198_v51, 0.0 }
  0xd0   :  { %v587_v37 = vpop.f32.mrf.mxu0 }
  0xd1   :  { %v208_v44 = vadd.f32 %v587_v37, %v75_v35  ;;  %v223_v60 = vmax.f32 %v193_v53, 0.0 }
  0xd2   :  { %v202_v39 = vpop.f32.mrf.mxu0 }
  0xd3   :  { %v203_v48 = vadd.f32 %v202_v39, %v70_v40  ;;  %v226_v52 = vmax.f32 %v208_v44, 0.0  ;;  %v423_v39 = vld [vmem:[%s827_s5] sm:$0x1]  ;;  %v430_v40 = vlaneseq }
  0xd4   :  { %v590_v41 = vpop.f32.mrf.mxu0 }
  0xd5   :  { %v218_v42 = vadd.f32 %v590_v41, %v85_v33  ;;  %v225_v54 = vmax.f32 %v203_v48, 0.0  ;;  %v431_v41 = vshrl.u32 %v430_v40, 7 }
  0xd6   :  { %v212_v43 = vpop.f32.mrf.mxu0 }
  0xd7   :  { %v228_v45 = vmax.f32 %v218_v42, 0.0  ;;  %v213_v46 = vadd.f32 %v212_v43, %v80_v38  ;;  %v432_v42 = vsub.s32 0, %v431_v41  ;;  %v428_v43 = vpop.permute.xlu0 %427 }
  0xd9   :  { %v227_v49 = vmax.f32 %v213_v46, 0.0  ;;  %591 = vmatprep.subr.mxu1 %v228_v45  ;;  %v433_v44 = vrot.slane %v428_v43, %v432_v42 }
  0xda   :  { %592 = vmatpush3.msra.mxu1 %v228_v45 }
  0xdb   :  { %593 = vmatprep.subr.mxu1 %v227_v49 }
  0xdc   :  { %594 = vmatpush3.msra.mxu1 %v227_v49 }
  0xdd   :  { %595 = vmatprep.subr.mxu1 %v226_v52 }
  0xde   :  { %596 = vmatpush3.msra.mxu1 %v226_v52 }
  0xdf   :  { %597 = vmatprep.subr.mxu1 %v225_v54 }
  0xe0   :  { %598 = vmatpush3.msra.mxu1 %v225_v54 }
  0xe1   :  { %599 = vmatprep.subr.mxu1 %v224_v57 }
  0xe2   :  { %600 = vmatpush3.msra.mxu1 %v224_v57 }
  0xe3   :  { %601 = vmatprep.subr.mxu1 %v223_v60 }
  0xe4   :  { %602 = vmatpush3.msra.mxu1 %v223_v60 }
  0xe5   :  { %603 = vmatprep.subr.mxu1 %v222_v61 }
  0xe6   :  { %604 = vmatpush3.msra.mxu1 %v222_v61 }
  0xe7   :  { %605 = vmatprep.subr.mxu1 %v221_v62 }
  0xe8   :  { %606 = vmatpush3.msra.mxu1 %v221_v62 }
  0xe9   :  { %608 = vmatmul.mubr.msk.f32.vlgmr.msra.gmra.mxu1 %vm285_vm2, %v230_v63 }
  0xea   :  { %610 = vmatprep.mubr.msk.f32.mxu1 %vm285_vm2, %v231_v0 }
  0xed   :  { %611 = vmatmul.mubr.msk.f32.gmra.mxu1 %vm285_vm2, %v232_v1 }
  0xee   :  { %613 = vmatprep.mubr.msk.f32.mxu1 %vm285_vm2, %v233_v2 }
  0xf1   :  { %614 = vmatmul.mubr.msk.f32.gmra.mxu1 %vm285_vm2, %v234_v3 }
  0xf2   :  { %616 = vmatprep.mubr.msk.f32.mxu1 %vm285_vm2, %v235_v4 }
  0xf5   :  { %617 = vmatmul.mubr.msk.f32.gmra.mxu1 %vm285_vm2, %v236_v5 }
 0x1a9   :  { %v609_v7 = vpop.f32.mrf.mxu1 }
 0x1aa   :  { %v382_v32 = vadd.f32 %v609_v7, %v253_v31 }
 0x1ab   :  { %v376_v8 = vpop.f32.mrf.mxu1 }
 0x1ac   :  { %v377_v35 = vadd.f32 %v376_v8, %v248_v34  ;;  %v416_v37 = vmax.f32 %v382_v32, 0.0 }
 0x1ad   :  { %v612_v10 = vpop.f32.mrf.mxu1 }
 0x1ae   :  { %v392_v27 = vadd.f32 %v612_v10, %v263_v23  ;;  %v415_v38 = vmax.f32 %v377_v35, 0.0 }
 0x1af   :  { %v386_v12 = vpop.f32.mrf.mxu1 }
 0x1b0   :  { %v387_v29 = vadd.f32 %v386_v12, %v258_v26  ;;  %v418_v33 = vmax.f32 %v392_v27, 0.0 }
 0x1b1   :  { %v615_v13 = vpop.f32.mrf.mxu1 }
 0x1b2   :  { %v402_v20 = vadd.f32 %v615_v13, %v273_v14  ;;  %v417_v36 = vmax.f32 %v387_v29, 0.0 }
 0x1b3   :  { %v396_v15 = vpop.f32.mrf.mxu1 }
 0x1b4   :  { %v397_v24 = vadd.f32 %v396_v15, %v268_v16  ;;  %v420_v28 = vmax.f32 %v402_v20, 0.0 }
 0x1b5   :  { %v618_v17 = vpop.f32.mrf.mxu1 }
 0x1b6   :  { %v412_v18 = vadd.f32 %v618_v17, %v283_v9  ;;  %v419_v30 = vmax.f32 %v397_v24, 0.0 }
 0x1b7   :  { %v406_v19 = vpop.f32.mrf.mxu1 }
 0x1b8   :  { %v422_v21 = vmax.f32 %v412_v18, 0.0  ;;  %v407_v22 = vadd.f32 %v406_v19, %v278_v11 }
 0x1ba   :  { %v421_v25 = vmax.f32 %v407_v22, 0.0  ;;  %620 = vmatpush3.msra.mxu0 %v422_v21 }
 0x1bb   :  { %621 = vmatprep.subr.mxu0 %v648_v6 }
 0x1bc   :  { %622 = vmatpush3.msra.mxu0 %v421_v25 }
 0x1bd   :  { %623 = vmatprep.subr.mxu0 %v648_v6 }
 0x1be   :  { %624 = vmatpush3.msra.mxu0 %v420_v28 }
 0x1bf   :  { %625 = vmatprep.subr.mxu0 %v648_v6 }
 0x1c0   :  { %626 = vmatpush3.msra.mxu0 %v419_v30 }
 0x1c1   :  { %627 = vmatprep.subr.mxu0 %v648_v6 }
 0x1c2   :  { %628 = vmatpush3.msra.mxu0 %v418_v33 }
 0x1c3   :  { %629 = vmatprep.subr.mxu0 %v648_v6 }
 0x1c4   :  { %630 = vmatpush3.msra.mxu0 %v417_v36 }
 0x1c5   :  { %631 = vmatprep.subr.mxu0 %v648_v6 }
 0x1c6   :  { %632 = vmatpush3.msra.mxu0 %v416_v37 }
 0x1c7   :  { %633 = vmatprep.subr.mxu0 %v648_v6 }
 0x1c8   :  { %634 = vmatpush3.msra.mxu0 %v415_v38 }
 0x1c9   :  { %636 = vmatmul.mubr.msk.f32.vlgmr.msra.gmra.mxu0 %vm285_vm2, %v423_v39 }
 0x289   :  { %v503_v45 = vpop.f32.mrf.mxu0 }
 0x28a   :  { %v504_v46 = vadd.f32 %v503_v45, %v433_v44 }
 0x28b   :  { %v637_v47 = vpop.f32.mrf.mxu0 }
 0x28c   :  { %v536_v48 = vmul.f32 -1.442695, %v504_v46 }
 0x28e   :  { %643 = vpow2.f32 %v536_v48 }
 0x29b   :  { %v644_v49 = vpop.eup %643 }
 0x29c   :  { %v510_v50 = vadd.f32 1.0, %v644_v49 }
 0x29e   :  { %645 = vrcp.f32 %v510_v50 }
 0x2ab   :  { %v646_v51 = vpop.eup %645 }
 0x2ac   :  { %513 = vst [vmem:[%s828_s7] sm:$0x1] %v646_v51 }

</bundles_post_ra>
